<compile_context>
chip_gen: v6e
topology: v6e:2x2x1
jax: 0.10.0
libtpu: 0.0.40
codegen_flags: <defaults>
</compile_context>

<pallas_src>
import jax
import jax.numpy as jnp
from jax.experimental import pallas as pl
from jax.experimental.pallas import tpu as pltpu
from typing import NamedTuple


def _round_up(x: int, m: int) -> int:
    return ((x + m - 1) // m) * m


class FusedHeadParams(NamedTuple):
    """Fused / padded / transposed fc_cls + fc_reg parameters (built once)."""
    w: jax.Array          # (Dp, Cp)  fused weight, (in, out) layout, K padded to tk
    b: jax.Array          # (1, Cp)   fused bias, zero-padded
    num_classes: int
    out_dim_reg: int
    in_dim: int           # original D (before K padding)
    tk: int               # K tile the weight was padded for


def prepare_bbox_head_params(w_cls, b_cls, w_reg, b_reg, *,
                             tk: int = 512, lane_pad: int = 128,
                             param_dtype=None) -> FusedHeadParams:
    """One-time weight prep (do this at model init, not per forward).

    w_cls: (num_classes, D) PyTorch-layout fc_cls.weight
    w_reg: (4, D)           PyTorch-layout fc_reg.weight (reg_class_agnostic)
    """
    num_classes, d = w_cls.shape
    out_dim_reg = w_reg.shape[0]
    assert w_reg.shape[1] == d

    c_out = num_classes + out_dim_reg
    cp = _round_up(c_out, lane_pad)                 # lane-dense output width

    d128 = _round_up(d, 128)
    tk_eff = max(128, min((tk // 128) * 128, d128)) # K tile, multiple of 128
    dp = _round_up(d, tk_eff)                       # K padded to a whole number of tiles

    w = jnp.concatenate([w_cls, w_reg], axis=0)     # (c_out, D) torch layout
    b = jnp.concatenate([b_cls, b_reg], axis=0)     # (c_out,)
    w = jnp.pad(w, ((0, cp - c_out), (0, dp - d)))  # zero pad: contributes nothing
    b = jnp.pad(b, (0, cp - c_out))
    w_t = jnp.transpose(w)                          # (Dp, Cp) — transposed ONCE here
    if param_dtype is not None:
        w_t = w_t.astype(param_dtype)               # e.g. bf16 weight stream (v6e/v7x)

    return FusedHeadParams(
        w=w_t,
        b=b.reshape(1, cp).astype(jnp.float32),
        num_classes=num_classes,
        out_dim_reg=out_dim_reg,
        in_dim=d,
        tk=tk_eff,
    )


def _bbox_head_fused_kernel(x_ref, w_ref, b_ref, o_ref, acc_ref):
    """One (tn, tk) x (tk, Cp) MXU step of the fused cls+reg matmul.

    grid = (row tiles, K tiles); the output block is resident across the K axis
    and accumulated in an f32 VMEM scratch (init at k==0, bias+store at k==last).
    """
    k = pl.program_id(1)

    @pl.when(k == 0)
    def _init():
        acc_ref[...] = jnp.zeros_like(acc_ref)

    x = x_ref[...]
    w = w_ref[...]
    if x.dtype != w.dtype:          # static (trace-time) decision
        x = x.astype(w.dtype)       # e.g. f32 activations vs bf16 weights
    acc_ref[...] += jnp.dot(x, w, preferred_element_type=jnp.float32)

    @pl.when(k == pl.num_programs(1) - 1)
    def _store():
        o_ref[...] = (acc_ref[...] + b_ref[...]).astype(o_ref.dtype)


def bbox_head_forward(x, params: FusedHeadParams, *, tn: int = 128):
    """BBoxHead.forward (no-pool path).

    x      : (N, C, H, W) RoI features (NCHW, like PyTorch)
    params : FusedHeadParams from prepare_bbox_head_params()
    returns (cls_score (N, num_classes), bbox_pred (N, 4))
    """
    n = x.shape[0]
    d = 1
    for s in x.shape[1:]:
        d *= s
    assert d == params.in_dim, "feature dim mismatch vs prepared weights"

    dp, cp = params.w.shape
    tk = params.tk

    # Glue (plain JAX): flatten exactly like torch x.view(N, -1).
    x_flat = x.reshape(n, d)

    # Row tile: multiple of 8 (f32 sublane), no larger than the padded row count.
    tn_eff = max(8, min(_round_up(n, 8), (max(tn, 8) // 8) * 8))
    np_pad = _round_up(n, tn_eff)

    # Zero-pad rows (sliced off later) and K (zeros contribute nothing).
    if np_pad != n or dp != d:
        x_flat = jnp.pad(x_flat, ((0, np_pad - n), (0, dp - d)))

    grid = (np_pad // tn_eff, dp // tk)

    # VMEM budget: 2x double-buffered tiles per operand + accumulator (f32).
    w_item = params.w.dtype.itemsize
    x_item = x_flat.dtype.itemsize
    vmem_need = (2 * (tn_eff * tk * x_item + tk * cp * w_item
                      + cp * 4 + tn_eff * cp * 4)
                 + tn_eff * cp * 4)
    vmem_limit = int(min(max(2 * vmem_need, 4 << 20), 32 << 20))

    bytes_accessed = int(x_flat.size * x_item
                         + params.w.size * w_item
                         + params.b.size * 4
                         + np_pad * cp * 4)

    out = pl.pallas_call(
        _bbox_head_fused_kernel,
        out_shape=jax.ShapeDtypeStruct((np_pad, cp), jnp.float32),
        grid_spec=pltpu.PrefetchScalarGridSpec(
            num_scalar_prefetch=0,
            grid=grid,
            in_specs=[
                pl.BlockSpec((tn_eff, tk), lambda i, k: (i, k)),   # x tile
                pl.BlockSpec((tk, cp), lambda i, k: (k, 0)),       # fused weight tile
                pl.BlockSpec((1, cp), lambda i, k: (0, 0)),        # fused bias row
            ],
            out_specs=pl.BlockSpec((tn_eff, cp), lambda i, k: (i, 0)),
            scratch_shapes=[pltpu.VMEM((tn_eff, cp), jnp.float32)],
        ),
        compiler_params=pltpu.CompilerParams(
            dimension_semantics=("parallel", "arbitrary"),
            vmem_limit_bytes=vmem_limit,
        ),
        cost_estimate=pl.CostEstimate(
            flops=2 * np_pad * dp * cp,
            transcendentals=0,
            bytes_accessed=bytes_accessed,
        ),
    )(x_flat, params.w, params.b)

    nc = params.num_classes
    cls_score = out[:n, :nc]
    bbox_pred = out[:n, nc:nc + params.out_dim_reg]
    return cls_score, bbox_pred


if __name__ == "__main__":
    # Small synthetic config consistent with the module:
    #   roi_feat_size=4, in_channels=32 -> D = 32*4*4 = 512
    #   num_classes=16, reg_class_agnostic=True -> out_dim_reg=4
    N = 16
    C = 32
    ROI = 4
    NUM_CLASSES = 16
    D = C * ROI * ROI

    key = jax.random.PRNGKey(0)
    kx, kwc, kwr = jax.random.split(key, 3)

    # Input RoI features (N, C, H, W), NCHW like PyTorch.
    x = jax.random.normal(kx, (N, C, ROI, ROI), dtype=jnp.float32)

    # Deterministic parameter init mirroring BBoxHead.init_weights():
    #   fc_cls.weight ~ N(0, 0.01), fc_cls.bias = 0
    #   fc_reg.weight ~ N(0, 0.001), fc_reg.bias = 0
    w_cls = 0.01 * jax.random.normal(kwc, (NUM_CLASSES, D), dtype=jnp.float32)
    b_cls = jnp.zeros((NUM_CLASSES,), dtype=jnp.float32)
    w_reg = 0.001 * jax.random.normal(kwr, (4, D), dtype=jnp.float32)
    b_reg = jnp.zeros((4,), dtype=jnp.float32)

    # One-time weight prep (fuse + pad to 128 lanes + transpose).
    # tk=128 deliberately exercises the K-reduction grid (4 K steps at D=512);
    # for production sizes use the larger defaults (tk=512..2048).
    params = prepare_bbox_head_params(w_cls, b_cls, w_reg, b_reg, tk=128)

    # tn=8 exercises the row grid (2 row tiles at N=16).
    cls_score, bbox_pred = bbox_head_forward(x, params, tn=8)
    jax.block_until_ready((cls_score, bbox_pred))

    # Cross-check against the pure-JAX reference of the PyTorch forward.
    x_flat = x.reshape(N, -1)
    ref_cls = x_flat @ w_cls.T + b_cls
    ref_reg = x_flat @ w_reg.T + b_reg
    assert cls_score.shape == (N, NUM_CLASSES) and bbox_pred.shape == (N, 4)
    assert jnp.allclose(cls_score, ref_cls, atol=1e-5, rtol=1e-5)
    assert jnp.allclose(bbox_pred, ref_reg, atol=1e-5, rtol=1e-5)

    # TODO(synk): temporal/spatial 3D pooling branches (with_temporal_pool /
    # with_spatial_pool) are off by default and not implemented here.
    print("KERNEL_OK")
</pallas_src>

<mosaic_0001>
module attributes {stable_mosaic.version = 11 : i64} {
  func.func @_bbox_head_fused_kernel(%arg0: i32, %arg1: i32, %arg2: memref<8x128xf32, #tpu.memory_space<vmem>>, %arg3: memref<128x128xf32, #tpu.memory_space<vmem>>, %arg4: memref<1x128xf32, #tpu.memory_space<vmem>>, %arg5: memref<8x128xf32, #tpu.memory_space<vmem>>, %arg6: memref<8x128xf32, #tpu.memory_space<vmem>>) attributes {dimension_semantics = [#tpu.dimension_semantics<parallel>, #tpu.dimension_semantics<arbitrary>], iteration_bounds = array<i64: 2, 4>, scalar_prefetch = 0 : i64, scratch_operands = 1 : i64, tpu.core_type = #tpu.core_type<tc>, window_params = [{transform_indices = @transform_0, window_bounds = array<i64: 8, 128>}, {transform_indices = @transform_1, window_bounds = array<i64: 128, 128>}, {pipeline_mode = #tpu.pipeline_mode<synchronous>, transform_indices = @transform_2, window_bounds = array<i64: 1, 128>}, {transform_indices = @transform_3, window_bounds = array<i64: 8, 128>}]} {
    %c0_i32 = arith.constant 0 : i32
    %0 = arith.cmpi eq, %arg1, %c0_i32 : i32
    %1 = arith.extui %0 : i1 to i32
    %c0_i32_0 = arith.constant 0 : i32
    %2 = arith.cmpi ne, %1, %c0_i32_0 : i32
    scf.if %2 {
      %cst_9 = arith.constant 0.000000e+00 : f32
      %12 = vector.broadcast %cst_9 : f32 to vector<8x128xf32>
      %c0_10 = arith.constant 0 : index
      %c0_11 = arith.constant 0 : index
      %13 = vector.load %arg6[%c0_10, %c0_11] : memref<8x128xf32, #tpu.memory_space<vmem>>, vector<8x128xf32>
      tpu.vector_store %arg6[%c0_10, %c0_11], %12 {strides = array<i32>} : memref<8x128xf32, #tpu.memory_space<vmem>>, vector<8x128xf32>,
    } else {
    }
    %c0 = arith.constant 0 : index
    %c0_1 = arith.constant 0 : index
    %3 = vector.load %arg2[%c0, %c0_1] : memref<8x128xf32, #tpu.memory_space<vmem>>, vector<8x128xf32>
    %c0_2 = arith.constant 0 : index
    %c0_3 = arith.constant 0 : index
    %4 = vector.load %arg3[%c0_2, %c0_3] : memref<128x128xf32, #tpu.memory_space<vmem>>, vector<128x128xf32>
    %c0_4 = arith.constant 0 : index
    %c0_5 = arith.constant 0 : index
    %5 = vector.load %arg6[%c0_4, %c0_5] : memref<8x128xf32, #tpu.memory_space<vmem>>, vector<8x128xf32>
    %cst = arith.constant dense<0.000000e+00> : vector<8x128xf32>
    %6 = tpu.matmul %3, %4, %cst {dimension_numbers = #tpu.dot_dimension_numbers<[1], [0], [0], [1], [0, 0, 1, 1], [], []>} : vector<8x128xf32>, vector<128x128xf32>, vector<8x128xf32> -> vector<8x128xf32>
    %7 = arith.addf %5, %6 : vector<8x128xf32>
    %c0_6 = arith.constant 0 : index
    %c0_7 = arith.constant 0 : index
    %8 = vector.load %arg6[%c0_6, %c0_7] : memref<8x128xf32, #tpu.memory_space<vmem>>, vector<8x128xf32>
    tpu.vector_store %arg6[%c0_6, %c0_7], %7 {strides = array<i32>} : memref<8x128xf32, #tpu.memory_space<vmem>>, vector<8x128xf32>,
    %c3_i32 = arith.constant 3 : i32
    %9 = arith.cmpi eq, %arg1, %c3_i32 : i32
    %10 = arith.extui %9 : i1 to i32
    %c0_i32_8 = arith.constant 0 : i32
    %11 = arith.cmpi ne, %10, %c0_i32_8 : i32
    scf.if %11 {
      %c0_9 = arith.constant 0 : index
      %c0_10 = arith.constant 0 : index
      %12 = vector.load %arg6[%c0_9, %c0_10] : memref<8x128xf32, #tpu.memory_space<vmem>>, vector<8x128xf32>
      %c0_11 = arith.constant 0 : index
      %c0_12 = arith.constant 0 : index
      %13 = vector.load %arg4[%c0_11, %c0_12] : memref<1x128xf32, #tpu.memory_space<vmem>>, vector<1x128xf32>
      %14 = vector.broadcast %13 : vector<1x128xf32> to vector<8x128xf32>
      %15 = arith.addf %12, %14 : vector<8x128xf32>
      %c0_13 = arith.constant 0 : index
      %c0_14 = arith.constant 0 : index
      %16 = vector.load %arg5[%c0_13, %c0_14] : memref<8x128xf32, #tpu.memory_space<vmem>>, vector<8x128xf32>
      tpu.vector_store %arg5[%c0_13, %c0_14], %15 {strides = array<i32>} : memref<8x128xf32, #tpu.memory_space<vmem>>, vector<8x128xf32>,
    } else {
    }
    return
  }
  func.func @transform_0(%arg0: i32, %arg1: i32) -> (i32, i32) {
    %c0_i32 = arith.constant 0 : i32
    return %arg0, %arg1 : i32, i32
  }
  func.func @transform_1(%arg0: i32, %arg1: i32) -> (i32, i32) {
    %c0_i32 = arith.constant 0 : i32
    %c0_i32_0 = arith.constant 0 : i32
    return %arg1, %c0_i32 : i32, i32
  }
  func.func @transform_2(%arg0: i32, %arg1: i32) -> (i32, i32) {
    %c0_i32 = arith.constant 0 : i32
    %c0_i32_0 = arith.constant 0 : i32
    %c0_i32_1 = arith.constant 0 : i32
    return %c0_i32, %c0_i32_0 : i32, i32
  }
  func.func @transform_3(%arg0: i32, %arg1: i32) -> (i32, i32) {
    %c0_i32 = arith.constant 0 : i32
    %c0_i32_0 = arith.constant 0 : i32
    return %arg0, %c0_i32 : i32, i32
  }
}

</mosaic_0001>

<bundles_post_ra>
// kernel: tpu_custom_call.1
= control target key start
LH: loop header
LB: loop body
LE: loop exit
PB: predicated region body
PF: predicated region fallthrough
CT: control target
= control target key end

     0   :  { %s1225_s0 = inlined_call_operand.hbm [shape: f32[16,512], index: 0, kind: input, shape index: {}]   ;;  %s1226_s1 = inlined_call_operand.hbm [shape: f32[512,128], index: 1, kind: input, shape index: {}]   ;;  %s1227_s2 = inlined_call_operand.vmem [shape: f32[1,128], index: 2, kind: input, shape index: {}]   ;;  %s1228_s3 = inlined_call_operand.hbm [shape: f32[16,128], index: 3, kind: output, shape index: {}]  }
   0x1   :  { %1237 = sst [smem:[#allocation20_spill]] %s1225_s0 }
   0x2   :  { %8 = vsyncpa [#allocation4], 0 }
   0x3   :  { %10 = vsyncpa [#allocation4 + $0x1], 0 }
   0x4   :  { %11 = vsyncpa [#allocation7], 0 }
   0x5   :  { %13 = vsyncpa [#allocation7 + $0x1], 0 }
   0x6   :  { %14 = vsyncpa [#allocation5], 0 }
   0x7   :  { %16 = vsyncpa [#allocation5 + $0x1], 0  ;;  %s916_s12 = smov 0   ;;  %s918_s13 = smov 0  }
   0x8   :  { %s920_s14 = smov 0   ;;  %s922_s15 = smov 0  }
   0x9   :  { %s924_s16 = smov 0   ;;  %s926_s17 = smov 0  }
   0xa   :  { %s928_s18 = smov 0   ;;  %s930_s19 = smov 0  }
   0xb   :  { %s932_s20 = smov 0   ;;  %s934_s21 = smov 0  }
   0xc   :  { %s936_s22 = smov 0   ;;  %s938_s23 = smov 0  }
   0xd   :  { %s940_s24 = smov 0   ;;  %s942_s25 = smov 0  }
   0xe LB: > { %1238 = sst [smem:[#allocation12_spill]] %s834_s12  ;;  %s1229_s26 = sadd.s32 4294967295, %s886_s25   ;;  %s886_s25 = sphi %s942_s25, %s22_s25   ;;  %s882_s24 = sphi %s940_s24, %s1281_s24   ;;  %s878_s23 = sphi %s938_s23, %s1280_s23   ;;  %s874_s22 = sphi %s936_s22, %s1279_s22   ;;  %s870_s21 = sphi %s934_s21, %s1278_s21   ;;  %s866_s20 = sphi %s932_s20, %s1268_s20   ;;  %s862_s19 = sphi %s930_s19, %s1277_s19   ;;  %s858_s18 = sphi %s928_s18, %s1276_s18   ;;  %s854_s17 = sphi %s926_s17, %s1275_s17   ;;  %s850_s16 = sphi %s924_s16, %s1274_s16   ;;  %s846_s15 = sphi %s922_s15, %s1273_s15   ;;  %s842_s14 = sphi %s920_s14, %s1265_s14   ;;  %s838_s13 = sphi %s918_s13, %s1272_s13   ;;  %s834_s12 = sphi %s916_s12, %s1271_s12  }
   0xf   : > { %1239 = sst [smem:[#allocation13_spill]] %s842_s14  ;;  %s31_s28 = sadd.s32 1, %s878_s23 }
  0x10   : > { %1240 = sst [smem:[#allocation14_spill]] %s866_s20  ;;  %s34_s29 = sadd.s32 1, %s882_s24 }
  0x11   : > { %p32_p0 = scmp.ge.s32.totalorder %s31_s28, 4  ;;  %s43_s30 = sadd.s32 1, %s866_s20 }
  0x12   : > { %p50_p1 = scmp.ne.s32.totalorder %s866_s20, %s862_s19  ;;  %p51_p2 = scmp.eq.s32.totalorder %s886_s25, 0 }
  0x13   : > { %s1283_s28 = smov (%p32_p0, %s31_s28), 0  ;;  %s1285_s29 = smov (!%p32_p0, %s34_s29), %s882_s24 }
  0x14   : > { %1241 = sst [smem:[#allocation15_spill]] %s1283_s28  ;;  %s39_s4 = ssub.s32 %s878_s23, %s1283_s28 }
  0x15   : > { %p999_p3 = por %p51_p2, %p50_p1  ;;  %p36_p4 = scmp.ge.s32.totalorder %s1285_s29, 2 }
  0x16   : > { %p56_p5 = scmp.ne.s32.totalorder %s862_s19, %s858_s18  ;;  %p1006_p6 = scmp.eq.s32.totalorder %s1229_s26, 0 }
  0x17   : > { %p67_p7 = scmp.eq.s32.totalorder %s39_s4, 0  ;;  %s1287_s29 = smov (%p36_p4, %s1285_s29), 0 }
  0x18   : > { %1244 = sst [smem:[#allocation16_spill]] %s1287_s29  ;;  %p1014_p8 = por %p1006_p6, %p56_p5 }
  0x19   : > { %s69_s8 = sadd.s32 1, %s854_s17  ;;  %s38_s9 = ssub.s32 %s882_s24, %s1287_s29 }
  0x1a   : > { %p76_p9 = scmp.ne.s32.totalorder %s854_s17, %s850_s16  ;;  %s40_s10 = sor.u32 %s39_s4, %s38_s9 }
  0x1b   : > { %p82_p10 = scmp.ne.s32.totalorder %s850_s16, %s846_s15  ;;  %p41_p11 = scmp.eq.s32.totalorder %s40_s10, 0 }
  0x1c   : > { %p1027_p12 = por %p76_p9, %p51_p2  ;;  %p114_p0 = scmp.eq.s32.totalorder %s38_s9, 0 }
  0x1d   : > { %s1032_s18 = scalar_select %p67_p7, %s854_s17, %s69_s8  }
  0x1e   : > { %s1035_s27 = scalar_select %p41_p11, %s866_s20, %s43_s30  }
  0x1f   : > { %1247 = sst [smem:[#allocation17_spill]] %s1032_s18  ;;  %p1039_p13 = por %p82_p10, %p1006_p6 }
  0x20   : > { %1248 = sst [smem:[#allocation18_spill]] %s1035_s27  ;;  %s116_s15 = sadd.s32 1, %s842_s14 }
  0x21   : > { %s1249_s26 = scalar_select %p1039_p13, 1, 0 }
  0x22   : > { %p126_p1 = scmp.ne.s32.totalorder %s842_s14, %s838_s13  ;;  %s1251_s10 = sadd.s32 4294967295, %s886_s25  }
  0x23   : > { %s1047_s4 = scalar_select %p114_p0, %s842_s14, %s116_s15  }
  0x24   : > { %p127_p2 = scmp.eq.s32.totalorder %s1251_s10, 7  ;;  %p132_p4 = scmp.ne.s32.totalorder %s838_s13, %s834_s12 }
  0x25   : > { %1250 = sst [smem:[#allocation19_spill]] %s1047_s4  ;;  %s1252_s8 = sadd.s32 4294967294, %s886_s25  }
  0x26   : > { %p133_p5 = scmp.eq.s32.totalorder %s1252_s8, 7  ;;  %p1055_p7 = por %p127_p2, %p126_p1 }
  0x27   : > { %p563_p6 = scmp.lt.s32.totalorder %s886_s25, 8  ;;  %s156_s9 = sand.u32 1, %s866_s20  }
  0x28   : > { %s1253_s30 = scalar_select %p1055_p7, 1, 0 }
  0x29   : > { %p1060_p9 = por %p133_p5, %p132_p4  ;;  %s476_s15 = sshll.u32 %s156_s9, 3 }
  0x2a   : > { %s477_s29 = sshll.u32 %s882_s24, 2  ;;  %s160_s10 = scalar_lea.vmem [#allocation3], %s476_s15 }
  0x2b   : > { %s1254_s6 = scalar_select %p1060_p9, 1, 0 }
  0x2c   : > { %s165_s28 = sadd.s32 %s878_s23, %s477_s29  ;;  %s169_s27 = sshll.u32 %s160_s10, 4  ;;  %s170_s27 = int_to_ptr.vmem [resolvable:$true] %s169_s27 }
  0x2d   : > { %s478_s18 = sshll.u32 %s165_s28, 7  ;;  %s1255_s0 = sld [smem:[#allocation20_spill]] }
  0x2e   : > { %p1072_p10 = pnand %p563_p6, %p999_p3  ;;  %p1078_p11 = pnand %p563_p6, %p1027_p12 }
  0x2f   : > { %p482_p0 = scmp.ge.s32.totalorder %s886_s25, 1  ;;  %p195_p1 = scmp.lt.s32.totalorder %s886_s25, 9 }
  0x30   : > { %s157_s29 = scalar_lea.sflag [#allocation4], %s156_s9  ;;  %p684_p2 = pneg %p1072_p10 }
  0x31   : > { %s695_s28 = scalar_lea.vmem %s170_s27, 128  ;;  %s888_s5 = smov [#allocation3]  }
  0x32   : > { %p696_p4 = scmp.ne.s32.totalorder %s170_s27, %s695_s28 }
  0x33   : > { %s167_s14 = scalar_lea.hbm %s1255_s0, %s478_s18  ;;  %s700_s18 = sshll.u32 %s888_s5, 4  ;;  %s701_s18 = int_to_ptr.vmem [resolvable:$false] %s700_s18 }
  0x34   : > { %p698_p5 = pnand %p696_p4, %p684_p2  ;;  %s702_s4 = scalar_lea.vmem %s701_s18, 256 }
  0x35   : > { %p703_p3 = scmp.lt.s32.totalorder %s170_s27, %s701_s18  ;;  %p704_p7 = scmp.lt.s32.totalorder %s702_s4, %s695_s28 }
  0x36   : > { %p699_p9 = pneg %p698_p5 }
  0x37   : > { %p705_p13 = por %p704_p7, %p703_p3 }
  0x39   : > { %p706_p12 = pnand %p705_p13, %p699_p9 }
  0x3b   : > { %709 = shalt.err (!%p706_p12)
}
  0x3c   : > { %555 = dma.hbm_to_vmem [thread:$0]  (!%p1072_p10), %s167_s14, 128, %s170_s27, %s157_s29  }
  0x3d   : > { %p1092_p6 = pnand %p482_p0, %p195_p1  ;;  %s176_s9 = sand.u32 1, %s854_s17  }
  0x3e   : > { %s493_s15 = sshll.u32 %s878_s23, 11  ;;  %s479_s10 = sshll.u32 %s176_s9, 7 }
  0x3f   : > { %s186_s5 = scalar_lea.hbm %s1226_s1, %s493_s15  ;;  %s180_s12 = scalar_lea.vmem [#allocation6], %s479_s10 }
  0x40   : > { %s187_s18 = sshll.u32 %s180_s12, 4  ;;  %s177_s4 = scalar_lea.sflag [#allocation7], %s176_s9  ;;  %s188_s18 = int_to_ptr.vmem [resolvable:$true] %s187_s18 }
  0x41   : > { %p712_p13 = pneg %p1078_p11  ;;  %s723_s14 = scalar_lea.vmem %s188_s18, 2048 }
  0x42   : > { %p724_p7 = scmp.ne.s32.totalorder %s188_s18, %s723_s14  ;;  %s889_s27 = smov [#allocation6]  }
  0x43   : > { %s728_s29 = sshll.u32 %s889_s27, 4  ;;  %s729_s29 = int_to_ptr.vmem [resolvable:$false] %s728_s29 }
  0x44   : > { %p726_p9 = pnand %p724_p7, %p712_p13  ;;  %s730_s0 = scalar_lea.vmem %s729_s29, 4096 }
  0x45   : > { %p731_p0 = scmp.lt.s32.totalorder %s188_s18, %s729_s29  ;;  %p732_p1 = scmp.lt.s32.totalorder %s730_s0, %s723_s14 }
  0x46   : > { %p727_p10 = pneg %p726_p9 }
  0x47   : > { %p733_p2 = por %p732_p1, %p731_p0 }
  0x49   : > { %p734_p4 = pnand %p733_p2, %p727_p10 }
  0x4b   : > { %737 = shalt.err (!%p734_p4)
}
  0x4c   : > { %s890_s15 = smov 128   ;;  %s891_s10 = smov 8  }
  0x4d   : > { %558 = dma.hbm_to_vmem [thread:$0]  (!%p1078_p11), %s186_s5, 2048, %s188_s18, %s177_s4, %s890_s15, %s890_s15, %s891_s10  }
  0x4e   : > { %199 = sbr.rel (%p1092_p6) target bundleno = 360 (0x168), region = 32  ;;  %s201_s9 = sand.u32 (!%p1092_p6), 1, %s862_s19  }
  0x4f   : > { %s1108_s8 = sshll.u32 (!%p1092_p6), %s201_s9, 3  ;;  %s202_s28 = scalar_lea.sflag (!%p1092_p6), [#allocation4], %s201_s9 }
  0x50   : > { %s205_s12 = scalar_lea.vmem (!%p1092_p6), [#allocation3], %s1108_s8 }
  0x53   : > { %821 = dma.done.wait (%p1014_p8), %s202_s28, 128  }
  0x54   : > { %823 = vsyncadd (%p1014_p8), %s202_s28, 4294967168  ;;  %s210_s0 = sand.u32 1, %s850_s16   ;;  %p1259_p11 = scmp.ne.s32.totalorder %s1249_s26, 0 }
  0x55   : > { %s484_s20 = sshll.u32 %s210_s0, 7  ;;  %s211_s5 = scalar_lea.sflag [#allocation7], %s210_s0 }
  0x56   : > { %s1116_s11 = scalar_lea.vmem [#allocation6], %s484_s20 }
  0x57   : > { %825 = dma.done.wait (%p1259_p11), %s211_s5, 2048  }
  0x58   : > { %827 = vsyncadd (%p1259_p11), %s211_s5, 4294965248  ;;  %s239_s18 = sand.u32 1, %s838_s13   ;;  %p486_p8 = scmp.ne.s32.totalorder %s870_s21, 0 }
  0x59   : > { %s1125_s4 = sshll.u32 %s239_s18, 3 }
  0x5a   : > { %s241_s7 = scalar_lea.vmem [#allocation8], %s1125_s4  ;;  %246 = sbr.rel (%p486_p8) target bundleno = 97 (0x61), region = 44 }
  0x5f   : > { %v892_v0 = vmov 0.0  }
  0x60   : > { %247 = vst [vmem:[#allocation2] sm:$0xff] %v892_v0 }
  0x61 PF: > { %v264_v1 = vld [vmem:[%s1116_s11 + $0x78] sm:$0xff]  ;;  %v893_v2 = vmov 0.0   ;;  %v263_v3 = vld [vmem:[%s1116_s11 + $0x70] sm:$0xff]  ;;  %vm894_vm0 = vmmov 0   ;;  %v262_v4 = vld [vmem:[%s1116_s11 + $0x68] sm:$0xff]  ;;  %p487_p5 = scmp.ne.s32.totalorder %s870_s21, 3 }
  0x62   : > { %511 = vmatprep.subr.mxu0 %v893_v2  ;;  %543 = vmatprep.mubr.msk.f32.mxu0 %vm894_vm0, %v893_v2  ;;  %v261_v5 = vld [vmem:[%s1116_s11 + $0x60] sm:$0xff]  ;;  %v260_v6 = vld [vmem:[%s1116_s11 + $0x58] sm:$0xff]  ;;  %v259_v7 = vld [vmem:[%s1116_s11 + $0x50] sm:$0xff] }
  0x63   : > { %512 = vmatpush3.msra.mxu0 %v264_v1  ;;  %v258_v8 = vld [vmem:[%s1116_s11 + $0x48] sm:$0xff]  ;;  %v257_v9 = vld [vmem:[%s1116_s11 + $0x40] sm:$0xff]  ;;  %v256_v10 = vld [vmem:[%s1116_s11 + $0x38] sm:$0xff] }
  0x64   : > { %513 = vmatprep.subr.mxu0 %v893_v2  ;;  %v255_v11 = vld [vmem:[%s1116_s11 + $0x30] sm:$0xff]  ;;  %v254_v12 = vld [vmem:[%s1116_s11 + $0x28] sm:$0xff]  ;;  %v253_v13 = vld [vmem:[%s1116_s11 + $0x20] sm:$0xff] }
  0x65   : > { %514 = vmatpush3.msra.mxu0 %v263_v3  ;;  %v252_v14 = vld [vmem:[%s1116_s11 + $0x18] sm:$0xff]  ;;  %v251_v15 = vld [vmem:[%s1116_s11 + $0x10] sm:$0xff]  ;;  %v250_v16 = vld [vmem:[%s1116_s11 + $0x8] sm:$0xff] }
  0x66   : > { %515 = vmatprep.subr.mxu0 %v893_v2  ;;  %v249_v17 = vld [vmem:[%s1116_s11] sm:$0xff]  ;;  %v248_v18 = vld [vmem:[%s205_s12] sm:$0xff] }
  0x67   : > { %516 = vmatpush3.msra.mxu0 %v262_v4  ;;  %v265_v19 = vld [vmem:[#allocation2] sm:$0xff] }
  0x68   : > { %517 = vmatprep.subr.mxu0 %v893_v2 }
  0x69   : > { %518 = vmatpush3.msra.mxu0 %v261_v5 }
  0x6a   : > { %519 = vmatprep.subr.mxu0 %v893_v2 }
  0x6b   : > { %520 = vmatpush3.msra.mxu0 %v260_v6 }
  0x6c   : > { %521 = vmatprep.subr.mxu0 %v893_v2 }
  0x6d   : > { %522 = vmatpush3.msra.mxu0 %v259_v7 }
  0x6e   : > { %523 = vmatprep.subr.mxu0 %v893_v2 }
  0x6f   : > { %524 = vmatpush3.msra.mxu0 %v258_v8 }
  0x70   : > { %525 = vmatprep.subr.mxu0 %v893_v2 }
  0x71   : > { %526 = vmatpush3.msra.mxu0 %v257_v9 }
  0x72   : > { %527 = vmatprep.subr.mxu0 %v893_v2 }
  0x73   : > { %528 = vmatpush3.msra.mxu0 %v256_v10 }
  0x74   : > { %529 = vmatprep.subr.mxu0 %v893_v2 }
  0x75   : > { %530 = vmatpush3.msra.mxu0 %v255_v11 }
  0x76   : > { %531 = vmatprep.subr.mxu0 %v893_v2 }
  0x77   : > { %532 = vmatpush3.msra.mxu0 %v254_v12 }
  0x78   : > { %533 = vmatprep.subr.mxu0 %v893_v2 }
  0x79   : > { %534 = vmatpush3.msra.mxu0 %v253_v13 }
  0x7a   : > { %535 = vmatprep.subr.mxu0 %v893_v2 }
  0x7b   : > { %536 = vmatpush3.msra.mxu0 %v252_v14 }
  0x7c   : > { %537 = vmatprep.subr.mxu0 %v893_v2 }
  0x7d   : > { %538 = vmatpush3.msra.mxu0 %v251_v15 }
  0x7e   : > { %539 = vmatprep.subr.mxu0 %v893_v2 }
  0x7f   : > { %540 = vmatpush3.msra.mxu0 %v250_v16 }
  0x80   : > { %541 = vmatprep.subr.mxu0 %v893_v2 }
  0x81   : > { %542 = vmatpush3.msra.mxu0 %v249_v17 }
  0x82   : > { %544 = vmatmul.mubr.f32.vlgmr.msra.gmra.mxu0 %v248_v18 }
 0x141   : > { %341 = sbr.rel (%p487_p5) target bundleno = 336 (0x150), region = 48 }
 0x142   : > { %v332_v20 = vpop.f32.mrf.mxu0 }
 0x143   : > { %v336_v21 = vadd.f32 %v332_v20, %v265_v19 }
 0x144   : > { %v545_v22 = vpop.f32.mrf.mxu0 }
 0x145   : > { %337 = vst [vmem:[#allocation2] sm:$0xff] %v336_v21 }
 0x146   : > { %v488_v24 = vld [vmem:[%s1227_s2] ss:$0 sm:$0xff] }
 0x14c   : > { %v342_v23 = vld [vmem:[#allocation2] sm:$0xff] }
 0x14d   : > { %v350_v25 = vadd.f32 %v488_v24, %v342_v23 }
 0x14f   : > { %351 = vst [vmem:[%s241_s7] sm:$0xff] %v350_v25 }
 0x150 PF: > { %s490_s27 = sshll.u32 %s874_s22, 7  ;;  %s366_s10 = sshll.u32 %s241_s7, 4  ;;  %s367_s10 = int_to_ptr.vmem [resolvable:$true] %s366_s10 }
 0x151   : > { %s364_s21 = scalar_lea.hbm %s1228_s3, %s490_s27  ;;  %s353_s9 = scalar_lea.sflag [#allocation5], %s239_s18 }
 0x152   : > { %s738_s8 = scalar_lea.vmem %s367_s10, 128  ;;  %p1260_p12 = scmp.ne.s32.totalorder %s1253_s30, 0 }
 0x153   : > { %p739_p3 = scmp.ne.s32.totalorder %s367_s10, %s738_s8  ;;  %s895_s28 = smov [#allocation8]  }
 0x154   : > { %s742_s12 = sshll.u32 %s895_s28, 4  ;;  %s743_s12 = int_to_ptr.vmem [resolvable:$false] %s742_s12 }
 0x155   : > { %p740_p6 = pnand %p739_p3, %p1260_p12  ;;  %s744_s0 = scalar_lea.vmem %s743_s12, 256 }
 0x156   : > { %p745_p7 = scmp.lt.s32.totalorder %s367_s10, %s743_s12  ;;  %p746_p9 = scmp.lt.s32.totalorder %s744_s0, %s738_s8 }
 0x157   : > { %p741_p13 = pneg %p740_p6 }
 0x158   : > { %p747_p10 = por %p746_p9, %p745_p7 }
 0x15a   : > { %p748_p0 = pnand %p747_p10, %p741_p13 }
 0x15c   : > { %751 = shalt.err (!%p748_p0)
}
 0x15d   : > { %s752_s22 = scalar_lea.hbm %s364_s21, 128  ;;  %s756_s11 = scalar_lea.hbm %s1228_s3, 256 }
 0x15e   : > { %p753_p1 = scmp.ne.s32.totalorder %s364_s21, %s752_s22  ;;  %p757_p11 = scmp.lt.s32.totalorder %s364_s21, %s1228_s3 }
 0x15f   : > { %p758_p8 = scmp.lt.s32.totalorder %s756_s11, %s752_s22 }
 0x160   : > { %p754_p2 = pnand %p753_p1, %p1260_p12 }
 0x161   : > { %p759_p5 = por %p758_p8, %p757_p11 }
 0x162   : > { %p755_p4 = pneg %p754_p2 }
 0x164   : > { %p760_p3 = pnand %p759_p5, %p755_p4 }
 0x166   : > { %763 = shalt.err (!%p760_p3)
}
 0x167   : > { %550 = dma.vmem_to_hbm [thread:$0]  (%p1260_p12), %s367_s10, 128, %s364_s21, %s353_s9  }
 0x168 PF: > { %s1261_s7 = sld [smem:[#allocation12_spill]]  ;;  %p564_p6 = scmp.ge.s32.totalorder %s886_s25, 2 }
 0x169   : > { %p1262_p13 = scmp.ne.s32.totalorder %s1254_s6, 0 }
 0x16b   : > { %p560_p7 = pnand %p564_p6, %p1262_p13 }
 0x16d   : > { %p561_p9 = pneg %p560_p7 }
 0x16e   : > { %s378_s26 = sand.u32 1, %s1261_s7  }
 0x16f   : > { %s379_s14 = scalar_lea.sflag [#allocation5], %s378_s26 }
 0x170   : > { %829 = dma.done.wait (%p561_p9), %s379_s14, 128  }
 0x171   : > { %831 = vsyncadd (%p561_p9), %s379_s14, 4294967168  ;;  %s22_s25 = sadd.s32 1, %s886_s25   ;;  %s1264_s30 = sld [smem:[#allocation13_spill]] }
 0x172   : > { %p1178_p10 = scmp.ge.s32.totalorder %s22_s25, 10   ;;  %s1265_s14 = sld [smem:[#allocation19_spill]] }
 0x173   : > { %s1266_s29 = sld [smem:[#allocation17_spill]]  ;;  %s1271_s12 = smov %s838_s13 }
 0x174   : > { %s1267_s21 = sld [smem:[#allocation14_spill]]  ;;  %s1273_s15 = smov %s850_s16 }
 0x175   : > { %s1268_s20 = sld [smem:[#allocation18_spill]]  ;;  %s1274_s16 = smov %s854_s17 }
 0x176   : > { %s1269_s6 = sld [smem:[#allocation15_spill]]  ;;  %s1276_s18 = smov %s862_s19 }
 0x177   : > { %s1270_s10 = sld [smem:[#allocation16_spill]]  ;;  %s1272_s13 = smov %s1264_s30 }
 0x178   : > { %s1279_s22 = smov %s882_s24 }
 0x179   : > { %s1275_s17 = smov %s1266_s29  ;;  %21 = sbr.rel (!%p1178_p10) target bundleno = 14 (0xe), region = 98 }
 0x17a   : > { %s1277_s19 = smov %s1267_s21  ;;  %s1278_s21 = smov %s878_s23 }
 0x17c   : > { %s1280_s23 = smov %s1269_s6 }
 0x17d   : > { %s1281_s24 = smov %s1270_s10 }
 0x17e   :  { %384 = vsyncpa [#allocation4], 1 }
 0x17f   :  { %386 = vsyncpa [#allocation4 + $0x1], 1 }
 0x180   :  { %387 = vsyncpa [#allocation7], 1 }
 0x181   :  { %389 = vsyncpa [#allocation7 + $0x1], 1 }
 0x182   :  { %390 = vsyncpa [#allocation5], 1 }
 0x183   :  { %392 = vsyncpa [#allocation5 + $0x1], 1 }

</bundles_post_ra>
